<compile_context>
chip_gen: v5e
topology: v5e:2x2
jax: 0.10.0
libtpu: 0.0.40
codegen_flags: <defaults>
</compile_context>

<pallas_src>
import jax
import jax.numpy as jnp
from jax import lax
from jax.experimental import pallas as pl
from jax.experimental.pallas import tpu as pltpu

_VMEM = pl.BlockSpec(memory_space=pltpu.MemorySpace.VMEM)
_EPS = 1e-5


# ---------------------------------------------------------------------------
# Pallas kernels
# ---------------------------------------------------------------------------
def conv_bn_relu_kernel(patches_ref, w_ref, b_ref, gamma_ref, beta_ref, o_ref):
    """Fused 3x3 conv (one im2col matmul) + training-mode BatchNorm2d + ReLU.

    patches: (9*Ci, N*H*W)   w: (Co, 9*Ci)   b/gamma/beta: (Co, 1)
    out:     (Co, N*H*W)     (channel rows, lane-dense flattened N*H*W columns)
    """
    y = jnp.dot(w_ref[...], patches_ref[...],
                preferred_element_type=jnp.float32) + b_ref[...]
    # BatchNorm2d (training): per-channel stats over (N, H, W) == per-row here.
    # Single-pass variance, clamped at 0 before rsqrt.
    mean = jnp.mean(y, axis=1, keepdims=True)
    mean2 = jnp.mean(y * y, axis=1, keepdims=True)
    var = jnp.maximum(mean2 - mean * mean, 0.0)
    y = (y - mean) * lax.rsqrt(var + _EPS)
    y = y * gamma_ref[...] + beta_ref[...]
    o_ref[...] = jnp.maximum(y, 0.0)


def maxpool_kernel(x_ref, o_ref):
    """MaxPool: elementwise max over the leading (window) axis (k*k, R, C)->(R, C)."""
    m = x_ref[0]
    for i in range(1, x_ref.shape[0]):        # static trip count, fully unrolled
        m = jnp.maximum(m, x_ref[i])
    o_ref[...] = m


def mlp_kernel(x_ref, w1_ref, b1_ref, w2_ref, b2_ref, w3_ref, b3_ref, o_ref):
    """Fused 3-layer MLP: Linear -> ReLU -> Linear -> ReLU -> Linear.

    Weights arrive in bf16 (halved weight DMA), activations are cast to bf16
    for the MXU, accumulation stays f32.  (The module's BatchNorm1d layers are
    unused in its forward pass, so none are applied.)
    """
    h = jnp.dot(x_ref[...].astype(jnp.bfloat16), w1_ref[...],
                preferred_element_type=jnp.float32) + b1_ref[...]
    h = jnp.maximum(h, 0.0)
    h = jnp.dot(h.astype(jnp.bfloat16), w2_ref[...],
                preferred_element_type=jnp.float32) + b2_ref[...]
    h = jnp.maximum(h, 0.0)
    o_ref[...] = (jnp.dot(h.astype(jnp.bfloat16), w3_ref[...],
                          preferred_element_type=jnp.float32)
                  + b3_ref[...]).astype(o_ref.dtype)


# ---------------------------------------------------------------------------
# Wrappers (layout plumbing only; all compute happens in the kernels above)
# ---------------------------------------------------------------------------
def conv_bn_relu(x, w, b, gamma, beta):
    """x: (N, Ci, H, W) f32; w: (Co, Ci, 3, 3); b/gamma/beta: (Co,)."""
    N, Ci, H, W = x.shape
    Co = w.shape[0]
    xp = jnp.pad(x, ((0, 0), (0, 0), (1, 1), (1, 1)))
    # im2col: patches[(ci, kh, kw), (n, h, w)] = xpad[n, ci, h+kh, w+kw]
    taps = jnp.stack([xp[:, :, kh:kh + H, kw:kw + W]
                      for kh in range(3) for kw in range(3)], axis=2)  # (N,Ci,9,H,W)
    patches = taps.transpose(1, 2, 0, 3, 4).reshape(Ci * 9, N * H * W)
    wf = w.reshape(Co, Ci * 9)
    out = pl.pallas_call(
        conv_bn_relu_kernel,
        out_shape=jax.ShapeDtypeStruct((Co, N * H * W), jnp.float32),
        in_specs=[_VMEM] * 5,
        out_specs=_VMEM,
    )(patches, wf, b.reshape(Co, 1), gamma.reshape(Co, 1), beta.reshape(Co, 1))
    return out.reshape(Co, N, H, W).transpose(1, 0, 2, 3)


def maxpool(x, k):
    """x: (N, C, H, W) -> (N, C, H//k, W//k) (kernel = stride = k, no padding)."""
    N, C, H, W = x.shape
    Ho, Wo = H // k, W // k
    xw = (x.reshape(N, C, Ho, k, Wo, k)
            .transpose(3, 5, 0, 1, 2, 4)
            .reshape(k * k, N, C * Ho * Wo))
    out = pl.pallas_call(
        maxpool_kernel,
        out_shape=jax.ShapeDtypeStruct((N, C * Ho * Wo), jnp.float32),
        in_specs=[_VMEM],
        out_specs=_VMEM,
    )(xw)
    return out.reshape(N, C, Ho, Wo)


def mlp_forward(x, mlp_params):
    (w1, b1), (w2, b2), (w3, b3) = mlp_params
    B = x.shape[0]
    out_dim = w3.shape[1]
    return pl.pallas_call(
        mlp_kernel,
        out_shape=jax.ShapeDtypeStruct((B, out_dim), jnp.float32),
        in_specs=[_VMEM] * 7,
        out_specs=_VMEM,
    )(x,
      w1.astype(jnp.bfloat16), b1.reshape(1, -1),
      w2.astype(jnp.bfloat16), b2.reshape(1, -1),
      w3.astype(jnp.bfloat16), b3.reshape(1, -1))


def cnn_worlds_forward(x, params):
    for (w, b, g, bt) in params["cnn1"]:
        x = conv_bn_relu(x, w, b, g, bt)
    x = maxpool(x, 4)
    for (w, b, g, bt) in params["cnn2"]:
        x = conv_bn_relu(x, w, b, g, bt)
    x = maxpool(x, 2)
    x = x.reshape(x.shape[0], -1)            # == torch .view(-1, input_size)
    return mlp_forward(x, params["mlp"])


# ---------------------------------------------------------------------------
# Pure-JAX reference mirroring the PyTorch forward (f32 everywhere)
# ---------------------------------------------------------------------------
def cnn_worlds_reference(x, params):
    def conv_bn_relu_ref(x, w, b, gamma, beta):
        y = lax.conv_general_dilated(
            x, w, window_strides=(1, 1), padding=((1, 1), (1, 1)),
            dimension_numbers=("NCHW", "OIHW", "NCHW"))
        y = y + b.reshape(1, -1, 1, 1)
        mean = jnp.mean(y, axis=(0, 2, 3), keepdims=True)
        var = jnp.mean((y - mean) ** 2, axis=(0, 2, 3), keepdims=True)
        y = (y - mean) / jnp.sqrt(var + _EPS)
        y = y * gamma.reshape(1, -1, 1, 1) + beta.reshape(1, -1, 1, 1)
        return jnp.maximum(y, 0.0)

    def maxpool_ref(x, k):
        N, C, H, W = x.shape
        return x.reshape(N, C, H // k, k, W // k, k).max(axis=(3, 5))

    for (w, b, g, bt) in params["cnn1"]:
        x = conv_bn_relu_ref(x, w, b, g, bt)
    x = maxpool_ref(x, 4)
    for (w, b, g, bt) in params["cnn2"]:
        x = conv_bn_relu_ref(x, w, b, g, bt)
    x = maxpool_ref(x, 2)
    x = x.reshape(x.shape[0], -1)
    (w1, b1), (w2, b2), (w3, b3) = params["mlp"]
    x = jnp.maximum(x @ w1 + b1, 0.0)
    x = jnp.maximum(x @ w2 + b2, 0.0)
    return x @ w3 + b3


# ---------------------------------------------------------------------------
# Deterministic parameter init (PyTorch-style uniform fan-in bounds)
# ---------------------------------------------------------------------------
def init_params(key, world_voxel=(16, 16)):
    input_size = world_voxel[0] * world_voxel[1] // 4     # matches the module
    keys = iter(jax.random.split(key, 64))

    def u(k, shape, fan_in):
        bound = 1.0 / jnp.sqrt(jnp.float32(fan_in))
        return jax.random.uniform(k, shape, jnp.float32, -bound, bound)

    def conv_layer(ci, co):
        w = u(next(keys), (co, ci, 3, 3), ci * 9)
        b = u(next(keys), (co,), ci * 9)
        return (w, b, jnp.ones((co,), jnp.float32), jnp.zeros((co,), jnp.float32))

    def linear(din, dout):
        w = u(next(keys), (din, dout), din)   # pre-transposed: y = x @ w
        b = u(next(keys), (dout,), din)
        return (w, b)

    cnn1 = [conv_layer(1, 4)] + [conv_layer(4, 4) for _ in range(4)]
    cnn2 = [conv_layer(4, 16)] + [conv_layer(16, 16) for _ in range(2)]
    mlp = [linear(input_size, 256), linear(256, 256), linear(256, 256)]
    return {"cnn1": cnn1, "cnn2": cnn2, "mlp": mlp}


if __name__ == "__main__":
    world_voxel = (16, 16)     # input_size = 16*16/4 = 64
    batch = 2

    key = jax.random.PRNGKey(0)
    k_x, k_p = jax.random.split(key)
    x = jax.random.normal(k_x, (batch, 1, world_voxel[0], world_voxel[1]), jnp.float32)
    params = init_params(k_p, world_voxel)

    out = jax.block_until_ready(cnn_worlds_forward(x, params))
    ref = jax.block_until_ready(cnn_worlds_reference(x, params))

    assert out.shape == (batch, 256), out.shape
    max_diff = float(jnp.max(jnp.abs(out - ref)))
    # bf16 MXU inputs in the MLP (f32 accumulation) => small drift vs f32 reference.
    assert jnp.allclose(out, ref, atol=2e-2, rtol=2e-2), f"max abs diff = {max_diff}"
    print("KERNEL_OK")
</pallas_src>

<mosaic_0001>
module attributes {stable_mosaic.version = 11 : i64} {
  func.func @conv_bn_relu_kernel(%arg0: memref<9x512xf32, #tpu.memory_space<vmem>>, %arg1: memref<4x9xf32, #tpu.memory_space<vmem>>, %arg2: memref<4x1xf32, #tpu.memory_space<vmem>>, %arg3: memref<4x1xf32, #tpu.memory_space<vmem>>, %arg4: memref<4x1xf32, #tpu.memory_space<vmem>>, %arg5: memref<4x512xf32, #tpu.memory_space<vmem>>) attributes {dimension_semantics = [], scalar_prefetch = 0 : i64, scratch_operands = 0 : i64, tpu.core_type = #tpu.core_type<tc>} {
    %c0 = arith.constant 0 : index
    %c0_0 = arith.constant 0 : index
    %0 = vector.load %arg1[%c0, %c0_0] : memref<4x9xf32, #tpu.memory_space<vmem>>, vector<4x9xf32>
    %c0_1 = arith.constant 0 : index
    %c0_2 = arith.constant 0 : index
    %1 = vector.load %arg0[%c0_1, %c0_2] : memref<9x512xf32, #tpu.memory_space<vmem>>, vector<9x512xf32>
    %cst = arith.constant dense<0.000000e+00> : vector<4x512xf32>
    %2 = tpu.matmul %0, %1, %cst {dimension_numbers = #tpu.dot_dimension_numbers<[1], [0], [0], [1], [0, 0, 1, 1], [], []>} : vector<4x9xf32>, vector<9x512xf32>, vector<4x512xf32> -> vector<4x512xf32>
    %c0_3 = arith.constant 0 : index
    %c0_4 = arith.constant 0 : index
    %3 = vector.load %arg2[%c0_3, %c0_4] : memref<4x1xf32, #tpu.memory_space<vmem>>, vector<4x1xf32>
    %4 = vector.broadcast %3 : vector<4x1xf32> to vector<4x512xf32>
    %5 = arith.addf %2, %4 : vector<4x512xf32>
    %cst_5 = arith.constant dense<0.000000e+00> : vector<4xf32>
    %6 = vector.multi_reduction <add>, %5, %cst_5 [1] : vector<4x512xf32> to vector<4xf32>
    %7 = vector.shape_cast %6 : vector<4xf32> to vector<4x1xf32>
    %cst_6 = arith.constant 5.120000e+02 : f32
    %8 = vector.broadcast %cst_6 : f32 to vector<4x1xf32>
    %9 = arith.divf %7, %8 : vector<4x1xf32>
    %10 = arith.mulf %5, %5 : vector<4x512xf32>
    %cst_7 = arith.constant dense<0.000000e+00> : vector<4xf32>
    %11 = vector.multi_reduction <add>, %10, %cst_7 [1] : vector<4x512xf32> to vector<4xf32>
    %12 = vector.shape_cast %11 : vector<4xf32> to vector<4x1xf32>
    %cst_8 = arith.constant 5.120000e+02 : f32
    %13 = vector.broadcast %cst_8 : f32 to vector<4x1xf32>
    %14 = arith.divf %12, %13 : vector<4x1xf32>
    %15 = arith.mulf %9, %9 : vector<4x1xf32>
    %16 = arith.subf %14, %15 : vector<4x1xf32>
    %cst_9 = arith.constant 0.000000e+00 : f32
    %17 = vector.broadcast %cst_9 : f32 to vector<4x1xf32>
    %18 = arith.maximumf %16, %17 : vector<4x1xf32>
    %19 = vector.broadcast %9 : vector<4x1xf32> to vector<4x512xf32>
    %20 = arith.subf %5, %19 : vector<4x512xf32>
    %cst_10 = arith.constant 9.99999974E-6 : f32
    %21 = vector.broadcast %cst_10 : f32 to vector<4x1xf32>
    %22 = arith.addf %18, %21 : vector<4x1xf32>
    %23 = math.rsqrt %22 : vector<4x1xf32>
    %24 = vector.broadcast %23 : vector<4x1xf32> to vector<4x512xf32>
    %25 = arith.mulf %20, %24 : vector<4x512xf32>
    %c0_11 = arith.constant 0 : index
    %c0_12 = arith.constant 0 : index
    %26 = vector.load %arg3[%c0_11, %c0_12] : memref<4x1xf32, #tpu.memory_space<vmem>>, vector<4x1xf32>
    %27 = vector.broadcast %26 : vector<4x1xf32> to vector<4x512xf32>
    %28 = arith.mulf %25, %27 : vector<4x512xf32>
    %c0_13 = arith.constant 0 : index
    %c0_14 = arith.constant 0 : index
    %29 = vector.load %arg4[%c0_13, %c0_14] : memref<4x1xf32, #tpu.memory_space<vmem>>, vector<4x1xf32>
    %30 = vector.broadcast %29 : vector<4x1xf32> to vector<4x512xf32>
    %31 = arith.addf %28, %30 : vector<4x512xf32>
    %cst_15 = arith.constant 0.000000e+00 : f32
    %32 = vector.broadcast %cst_15 : f32 to vector<4x512xf32>
    %33 = arith.maximumf %31, %32 : vector<4x512xf32>
    %c0_16 = arith.constant 0 : index
    %c0_17 = arith.constant 0 : index
    %34 = vector.load %arg5[%c0_16, %c0_17] : memref<4x512xf32, #tpu.memory_space<vmem>>, vector<4x512xf32>
    tpu.vector_store %arg5[%c0_16, %c0_17], %33 {strides = array<i32>} : memref<4x512xf32, #tpu.memory_space<vmem>>, vector<4x512xf32>,
    return
  }
}

</mosaic_0001>

<bundles_post_ra>
// kernel: tpu_custom_call.1
= control target key start
LH: loop header
LB: loop body
LE: loop exit
PB: predicated region body
PF: predicated region fallthrough
CT: control target
= control target key end

     0   :  { %10 = vsyncpa [#allocation3], 0  ;;  %s407_s0 = inlined_call_operand.hbm [shape: f32[9,512], index: 0, kind: input, shape index: {}]   ;;  %s408_s1 = inlined_call_operand.vmem [shape: f32[4,9], index: 1, kind: input, shape index: {}]   ;;  %s409_s2 = inlined_call_operand.vmem [shape: f32[4,1], index: 2, kind: input, shape index: {}]   ;;  %s410_s3 = inlined_call_operand.vmem [shape: f32[4,1], index: 3, kind: input, shape index: {}]   ;;  %s411_s4 = inlined_call_operand.vmem [shape: f32[4,1], index: 4, kind: input, shape index: {}]   ;;  %s412_s5 = inlined_call_operand.hbm [shape: f32[4,512], index: 5, kind: output, shape index: {}]  }
   0x1   :  { %11 = vsyncpa [#allocation4], 0  ;;  %s16_s20 = sshll.u32 %s407_s0, 4  ;;  %s329_s21 = smov [#allocation2]   ;;  %s17_s20 = int_to_ptr.hbm [resolvable:$true] %s16_s20 }
   0x2   :  { %s18_s22 = sshll.u32 %s329_s21, 4  ;;  %s330_s23 = smov 512   ;;  %s19_s22 = int_to_ptr.vmem [resolvable:$true] %s18_s22 }
   0x3   :  { %s331_s24 = smov 32  }
   0x4   :  { %24 = dma.hbm_to_vmem [thread:$0]  %s17_s20, 1024, %s19_s22, [#allocation3], %s330_s23, %s330_s23, %s331_s24  }
   0x5   :  { %325 = dma.done.wait [#allocation3], 1024  }
   0x6   :  { %326 = vsyncadd [#allocation3], 4294966272  ;;  %v332_v0 = vmov 0   ;;  %vm56_vm0 = vcmask 1040384   ;;  %v44_v1 = vld [vmem:[#allocation2 + $0x30] sm:$0x1] }
   0x7   :  { %270 = vset.pattern.permute.xlu0 %v332_v0  ;;  %271 = vset.pattern.permute.xlu1 %v332_v0  ;;  %v45_v2 = vld [vmem:[#allocation2 + $0x38] sm:$0x1]  ;;  %v40_v3 = vld [vmem:[#allocation2 + $0x10] sm:$0xff]  ;;  %v37_v5 = vld [vmem:[%s408_s1] sm:$0xf]  ;;  %vm52_vm1 = vcmask 72704  }
   0x8   :  { %272 = vset.pattern.permute.xlu2 %v332_v0  ;;  %260 = vmatpush.msk.msra.mxu2 %vm56_vm0, %v44_v1  ;;  %v41_v4 = vld [vmem:[#allocation2 + $0x18] sm:$0xff]  ;;  %v42_v6 = vld [vmem:[#allocation2 + $0x20] sm:$0x1]  ;;  %v43_v7 = vld [vmem:[#allocation2 + $0x28] sm:$0x1]  ;;  %vm149_vm2 = vcmask 1043456  }
   0x9   :  { %262 = vmatpush.msk.msra.mxu3 %vm56_vm0, %v45_v2  ;;  %256 = vmatpush.msk.msra.mxu0 %vm56_vm0, %v42_v6  ;;  %v38_v8 = vld [vmem:[#allocation2] sm:$0xff]  ;;  %v39_v10 = vld [vmem:[#allocation2 + $0x8] sm:$0xff]  ;;  %v333_v40 = vmov 512.0   ;;  %s246_s7 = sshll.u32 %s412_s5, 4  ;;  %s247_s7 = int_to_ptr.hbm [resolvable:$true] %s246_s7 }
   0xa   :  { %124 = vmatpush.msra.mxu2 %v40_v3  ;;  %v46_v9 = vld [vmem:[%s409_s2] sm:$0xf]  ;;  %258 = vmatpush.msk.msra.mxu1 %vm56_vm0, %v43_v7  ;;  %273 = vrcp.f32 %v333_v40 }
   0xb   :  { %144 = vmatpush.msra.mxu3 %v41_v4  ;;  %261 = vmatmul.msk.f32.vlgmr.msra.gmra.mxu2 %vm52_vm1, %v37_v5  ;;  %v213_v31 = vld [vmem:[%s411_s4] sm:$0xf] }
   0xc   :  { %263 = vmatmul.msk.f32.vlgmr.msra.gmra.mxu3 %vm52_vm1, %v37_v5  ;;  %84 = vmatpush.msra.mxu0 %v38_v8  ;;  %v203_v39 = vld [vmem:[%s410_s3] sm:$0xf]  ;;  %s334_s3 = smov [#allocation5]  }
   0xd   :  { %257 = vmatmul.msk.f32.vlgmr.msra.gmra.mxu0 %vm52_vm1, %v37_v5  ;;  %49 = vperm.xlu0 %270, %v46_v9   ;;  %s244_s4 = sshll.u32 %s334_s3, 4  ;;  %s245_s4 = int_to_ptr.vmem [resolvable:$true] %s244_s4 }
   0xe   :  { %104 = vmatpush.msra.mxu1 %v39_v10  ;;  %216 = vperm.xlu2 %272, %v213_v31  }
   0xf   :  { %259 = vmatmul.msk.f32.vlgmr.msra.gmra.mxu1 %vm52_vm1, %v37_v5 }
  0x10   :  { %v274_v41 = vpop.eup %273 }
  0x11   :  { %v160_v42 = vmul.f32 512.0, %v274_v41  ;;  %vm164_vm3 = vweird.f32 %v274_v41 }
  0x13   :  { %v161_v43 = vsub.f32 1.0, %v160_v42 }
  0x15   :  { %v162_v44 = vmul.f32 %v274_v41, %v161_v43 }
  0x17   :  { %v163_v45 = vadd.f32 %v274_v41, %v162_v44 }
  0x19   :  { %v165_v46 = vsel %vm164_vm3, %v274_v41, %v163_v45 }
  0x68   :  { %v217_v7 = vpop.permute.xlu2 %216 }
  0x7f   :  { %v50_v11 = vpop.permute.xlu0 %49 }
  0x8a   :  { %v86_v12 = vpop.f32.mrf.mxu0 }
  0x8b   :  { %v382_v13 = vadd.f32 %v86_v12, %v50_v11 }
  0x8c   :  { %v106_v14 = vpop.f32.mrf.mxu1 }
  0x8d   :  { %v150_v15 = vsel %vm149_vm2, %v382_v13, 0.0  ;;  %v167_v16 = vmul.f32 %v382_v13, %v382_v13  ;;  %v107_v17 = vadd.f32 %v106_v14, %v50_v11 }
  0x8e   :  { %v126_v18 = vpop.f32.mrf.mxu2 }
  0x8f   :  { %v146_v19 = vpop.f32.mrf.mxu3  ;;  %v151_v20 = vsel %vm149_vm2, %v107_v17, 0.0  ;;  %v168_v21 = vmul.f32 %v107_v17, %v107_v17  ;;  %v127_v22 = vadd.f32 %v126_v18, %v50_v11  ;;  %v171_v25 = vsel %vm149_vm2, %v167_v16, 0.0 }
  0x90   :  { %v147_v23 = vadd.f32 %v146_v19, %v50_v11  ;;  %v152_v24 = vadd.f32 %v151_v20, %v150_v15 }
  0x91   :  { %v153_v26 = vsel %vm149_vm2, %v127_v22, 0.0  ;;  %v169_v27 = vmul.f32 %v127_v22, %v127_v22  ;;  %v172_v30 = vsel %vm149_vm2, %v168_v21, 0.0 }
  0x92   :  { %v154_v28 = vadd.f32 %v153_v26, %v152_v24  ;;  %v170_v29 = vmul.f32 %v147_v23, %v147_v23  ;;  %v155_v32 = vsel %vm149_vm2, %v147_v23, 0.0  ;;  %v173_v33 = vadd.f32 %v172_v30, %v171_v25 }
  0x93   :  { %v174_v34 = vsel %vm149_vm2, %v169_v27, 0.0 }
  0x94   :  { %v156_v35 = vadd.f32 %v155_v32, %v154_v28  ;;  %v175_v36 = vadd.f32 %v174_v34, %v173_v33  ;;  %v176_v37 = vsel %vm149_vm2, %v170_v29, 0.0 }
  0x96   :  { %157 = vadd.xlane.f32.xlu0 %v156_v35  ;;  %v177_v38 = vadd.f32 %v176_v37, %v175_v36 }
  0x98   :  { %178 = vadd.xlane.f32.xlu1 %v177_v38 }
  0xb1   :  { %206 = vperm.xlu1 %271, %v203_v39  }
 0x109   :  { %v158_v47 = vpop.xlane.xlu0 %157 }
 0x10a   :  { %v166_v48 = vmul.f32 %v165_v46, %v158_v47 }
 0x10b   :  { %v179_v49 = vpop.xlane.xlu1 %178 }
 0x10c   :  { %v181_v50 = vmul.f32 %v166_v48, %v166_v48  ;;  %v180_v51 = vmul.f32 %v179_v49, %v165_v46  ;;  %v184_v61 = vsub.f32 %v382_v13, %v166_v48  ;;  %v185_v62 = vsub.f32 %v107_v17, %v166_v48 }
 0x10d   :  { %v186_v63 = vsub.f32 %v127_v22, %v166_v48  ;;  %v187_v0 = vsub.f32 %v147_v23, %v166_v48 }
 0x10e   :  { %v182_v52 = vsub.f32 %v180_v51, %v181_v50 }
 0x110   :  { %v183_v53 = vmax.f32 %v182_v52, 0.0 }
 0x112   :  { %v188_v54 = vadd.f32 1e-05, %v183_v53 }
 0x114   :  { %275 = vrsqrt.f32 %v188_v54  ;;  %vm195_vm5 = vweird.f32 %v188_v54 }
 0x11a   :  { %v276_v55 = vpop.eup %275 }
 0x11b   :  { %v190_v56 = vmul.f32 %v276_v55, %v188_v54  ;;  %vm196_vm4 = vweird.f32 %v276_v55 }
 0x11c   :  { %vm197_vm6 = vmor %vm195_vm5, %vm196_vm4 }
 0x11d   :  { %v191_v57 = vmul.f32 %v276_v55, %v190_v56 }
 0x11f   :  { %v192_v58 = vmul.f32 0.5, %v191_v57 }
 0x121   :  { %v193_v59 = vsub.f32 1.5, %v192_v58 }
 0x123   :  { %v194_v60 = vmul.f32 %v276_v55, %v193_v59  ;;  %v207_v1 = vpop.permute.xlu1 %206 }
 0x125   :  { %v198_v2 = vsel %vm197_vm6, %v276_v55, %v194_v60 }
 0x126   :  { %v199_v3 = vmul.f32 %v198_v2, %v184_v61  ;;  %v200_v4 = vmul.f32 %v198_v2, %v185_v62  ;;  %v201_v5 = vmul.f32 %v198_v2, %v186_v63  ;;  %v202_v6 = vmul.f32 %v198_v2, %v187_v0 }
 0x128   :  { %v209_v8 = vmul.f32 %v207_v1, %v199_v3  ;;  %v210_v9 = vmul.f32 %v207_v1, %v200_v4  ;;  %v211_v10 = vmul.f32 %v207_v1, %v201_v5  ;;  %v212_v11 = vmul.f32 %v207_v1, %v202_v6 }
 0x12a   :  { %v219_v12 = vadd.f32 %v217_v7, %v209_v8  ;;  %v220_v14 = vadd.f32 %v217_v7, %v210_v9  ;;  %v221_v15 = vadd.f32 %v217_v7, %v211_v10  ;;  %v222_v16 = vadd.f32 %v217_v7, %v212_v11 }
 0x12c   :  { %v224_v18 = vmax.f32 %v220_v14, 0.0  ;;  %v226_v13 = vmax.f32 %v222_v16, 0.0  ;;  %v223_v17 = vmax.f32 %v219_v12, 0.0  ;;  %v225_v19 = vmax.f32 %v221_v15, 0.0 }
 0x12e   :  { %v231_v20 = vrot.slane %v224_v18, 4  ;;  %v232_v21 = vrot.slane %v226_v13, 4 }
 0x130   :  { %v233_v22 = vsel %vm149_vm2, %v223_v17, %v231_v20  ;;  %v234_v23 = vsel %vm149_vm2, %v225_v19, %v232_v21 }
 0x131   :  { %237 = vst [vmem:[#allocation5] sm:$0xff] %v233_v22 }
 0x132   :  { %238 = vst [vmem:[#allocation5 + $0x8] sm:$0xff] %v234_v23 }
 0x133   :  { %249 = dma.vmem_to_hbm [thread:$0]  %s245_s4, 256, %s247_s7, [#allocation4]  }
 0x134   :  { %327 = dma.done.wait [#allocation4], 256  }
 0x135   :  { %328 = vsyncadd [#allocation4], 4294967040 }
 0x136   :  { %254 = vsyncpa [#allocation3], 1 }
 0x137   :  { %255 = vsyncpa [#allocation4], 1 }

</bundles_post_ra>
